<compile_context>
chip_gen: v6e
topology: v6e:2x2x1
jax: 0.10.0
libtpu: 0.0.40
codegen_flags: <defaults>
</compile_context>

<pallas_src>
import re

import jax
import jax.numpy as jnp
from jax.experimental import pallas as pl
from jax.experimental.pallas import tpu as pltpu

_HCHUNK = 8  # hidden-axis chunk = one sublane group


def _chip_caps():
    """Best-effort (vmem_capacity_bytes, tpu_generation) with safe fallbacks."""
    gen = 0
    try:
        kind = jax.devices()[0].device_kind
        m = re.search(r"(\d+)", kind)
        if m:
            gen = int(m.group(1))
    except Exception:
        pass
    vmem = None
    try:
        vmem = int(pltpu.get_tpu_info().vmem_capacity_bytes)
    except Exception:
        vmem = None
    if vmem is None:
        # v4/v5e/v6e: 128 MiB per core; v7x (and unknown): assume the small 64 MiB.
        vmem = (128 << 20) if 4 <= gen <= 6 else (64 << 20)
    return vmem, gen


def _make_kernel(compute_dtype, out_from_input):
    cd = compute_dtype

    def kernel(y_ref, wc_ref, ws_ref, b2_ref, out_ref):
        b2c = b2_ref[0]                                  # SMEM scalars
        b2s = b2_ref[1]

        # Single VMEM load of the input block; one f32 cast reused by both
        # branch means and (in f32-compute mode) the final multiply.
        y_in = y_ref[...]                                # (Bt, C, HW), HBM dtype
        y32 = y_in.astype(jnp.float32)

        # ---- channel branch: AdaptiveAvgPool2d(1) -> SlowNet_GC -> HyperZZW_2E
        y_c = jnp.mean(y32, axis=2, keepdims=True)                   # (Bt, C, 1)
        w1c = wc_ref[0:1, :]                                         # (1, hid)
        b1c = wc_ref[1:2, :]
        w2c = wc_ref[2:3, :]
        h_c = jax.nn.gelu(y_c * w1c + b1c, approximate=True)         # (Bt, C, hid)
        hk_gc = jnp.sum(h_c * w2c, axis=-1, keepdims=True) + b2c     # (Bt, C, 1)
        score_c = hk_gc * y_c                                        # (Bt, C, 1)
        # TODO(synk): for C >= 128 put C on the lane axis here (small transpose)
        # so channel-branch vregs are fully occupied; negligible at small C.

        # ---- spatial branch: channel mean -> SlowNet_G -> HyperZZW_2E
        y_s = jnp.mean(y32, axis=1, keepdims=True)                   # (Bt, 1, HW) f32
        y_sc = y_s.astype(cd)
        bt, _, hw = y_s.shape
        hid_p = ws_ref.shape[0]
        acc8 = jnp.zeros((bt, _HCHUNK, hw), jnp.float32)
        # Hidden axis in sublane-sized chunks: never materializes the
        # (Bt, hid, HW) GELU intermediate; cross-chunk accumulation is plain
        # VALU adds and the only cross-sublane reduce is the final 8-row sum.
        for i in range(hid_p // _HCHUNK):                # small static trip count
            lo, hi = i * _HCHUNK, (i + 1) * _HCHUNK
            w1 = ws_ref[lo:hi, 0:1].astype(cd)[None]     # (1, 8, 1)
            b1 = ws_ref[lo:hi, 1:2].astype(cd)[None]
            w2 = ws_ref[lo:hi, 2:3].astype(cd)[None]
            h = jax.nn.gelu(w1 * y_sc + b1, approximate=True)        # (Bt, 8, HW)
            acc8 = acc8 + (h * w2).astype(jnp.float32)
        hk_gs = jnp.sum(acc8, axis=1, keepdims=True) + b2s           # (Bt, 1, HW)
        score_s = hk_gs * y_s                                        # (Bt, 1, HW)

        # ---- combine + sigmoid gate (tanh form: one EUP push per element) ----
        sc_s = score_s.astype(cd)
        sc_c = score_c.astype(cd)
        score = 0.5 * (jnp.tanh(0.5 * (sc_s * sc_c)) + 1.0)          # (Bt, C, HW)
        y_out = y_in if out_from_input else y32
        out_ref[...] = (y_out * score).astype(out_ref.dtype)

    return kernel


def _choose_bt(B, C, HW, hbm_itemsize, cd_itemsize, vmem_cap, gen):
    """Pick a batch tile so in/out double-buffered DMAs + compute temporaries fit
    the generation-appropriate VMEM budget, while keeping enough grid steps for
    DMA/compute overlap (and, on 2-TC chips, work on both TensorCores)."""
    HWp = pl.cdiv(HW, 128) * 128         # lane padding Mosaic applies inside VMEM
    per_batch = (4 * C * HWp * hbm_itemsize                      # in+out blocks x 2 buffers
                 + C * HWp * (4 + 2 * cd_itemsize)               # y32 + gate/product temps
                 + HWp * (_HCHUNK * (4 + cd_itemsize) + 16))     # acc8, h chunk, y_s/hk/score_s
    if vmem_cap >= (100 << 20):          # v5e / v6e class: 128 MiB physical VMEM
        budget, limit_cap = 88 << 20, 104 << 20
    else:                                # v7x class: 64 MiB physical VMEM
        budget, limit_cap = 26 << 20, 48 << 20
    bt = max(1, min(B, budget // max(per_batch, 1)))
    # >= 2 steps so input/output DMA overlaps compute; >= 4 on 2-TC chips.
    min_steps = min(B, 4 if gen >= 7 else 2)
    if min_steps > 1:
        bt = min(bt, pl.cdiv(B, min_steps))
    return int(bt), int(per_batch), int(limit_cap)


def hyper_interact(y, params):
    """y: (B, C, H, W).  Returns y * sigmoid(score) (the x=None path of
    HyperInteract.forward).  Output dtype matches the input dtype; pass bf16
    to halve HBM traffic (accumulations stay f32 inside the kernel)."""
    B, C, H, W = y.shape
    HW = H * W
    w1c, b1c, w2c, b2c, w1s, b1s, w2s, b2s = params
    hidden = w1c.shape[1]
    hid_p = pl.cdiv(hidden, _HCHUNK) * _HCHUNK

    vmem_cap, gen = _chip_caps()
    # bf16 VPU/EUP exists on v6e/v7x (not v5e): run the spatial GELU and the
    # sigmoid gate in bf16 only when the caller already traffics bf16.
    use_bf16 = bool(gen >= 6) and (y.dtype == jnp.bfloat16)
    compute_dtype = jnp.bfloat16 if use_bf16 else jnp.float32
    cd_itemsize = 2 if use_bf16 else 4

    # Pack the 8 micro weight arrays into 2 small VMEM arrays + 1 SMEM scalar
    # pair, zero-padding the hidden axis to a sublane multiple (padded rows
    # have w2 == 0, so they contribute nothing).
    wc = jnp.concatenate([w1c, b1c, w2c], axis=0).astype(jnp.float32)      # (3, hid)
    ws = jnp.concatenate([w1s, b1s, w2s], axis=1).astype(jnp.float32)      # (hid, 3)
    if hid_p != hidden:
        wc = jnp.pad(wc, ((0, 0), (0, hid_p - hidden)))
        ws = jnp.pad(ws, ((0, hid_p - hidden), (0, 0)))
    b2 = jnp.concatenate([b2c.reshape(-1), b2s.reshape(-1)]).astype(jnp.float32)

    # No wrapper-side pad/depad of HW: the block spans the full (C, HW) extent,
    # so a non-128-multiple HW only costs masked stores on the last lane group
    # instead of two extra full HBM passes.
    y2 = y.reshape(B, C, HW)

    bt, per_batch, limit_cap = _choose_bt(
        B, C, HW, y2.dtype.itemsize, cd_itemsize, vmem_cap, gen)
    grid = (pl.cdiv(B, bt),)             # ragged last batch block is allowed

    vmem_est = bt * per_batch + (1 << 20)
    vmem_limit = min(max(vmem_est, 32 << 20), limit_cap)
    if vmem_est > vmem_limit:
        # A single-batch block alone exceeds the preferred clamp: give the
        # compiler everything the chip has (minus headroom) rather than fail.
        # TODO(synk): for even larger C*HW, split HW into a second "arbitrary"
        # grid axis with a two-pass (HW-sum, then per-chunk output) scheme.
        vmem_limit = min(vmem_est, vmem_cap - (12 << 20))
    vmem_limit = int(vmem_limit)

    out = pl.pallas_call(
        _make_kernel(compute_dtype, out_from_input=use_bf16),
        out_shape=jax.ShapeDtypeStruct((B, C, HW), y.dtype),
        grid_spec=pltpu.PrefetchScalarGridSpec(
            num_scalar_prefetch=0,
            grid=grid,
            in_specs=[
                pl.BlockSpec((bt, C, HW), lambda b: (b, 0, 0)),
                pl.BlockSpec((3, hid_p), lambda b: (0, 0)),
                pl.BlockSpec((hid_p, 3), lambda b: (0, 0)),
                pl.BlockSpec(memory_space=pltpu.MemorySpace.SMEM),
            ],
            out_specs=pl.BlockSpec((bt, C, HW), lambda b: (b, 0, 0)),
        ),
        compiler_params=pltpu.CompilerParams(
            dimension_semantics=("parallel",),
            vmem_limit_bytes=vmem_limit),
    )(y2, wc, ws, b2)

    return out.reshape(B, C, H, W)


def hyper_interact_ref(y, params):
    """Pure-JAX reference of the same forward pass (f32)."""
    w1c, b1c, w2c, b2c, w1s, b1s, w2s, b2s = params
    B, C, H, W = y.shape
    # channel branch
    y_c = jnp.mean(y, axis=(2, 3))[:, :, None]                      # (B, C, 1)
    h_c = jax.nn.gelu(y_c * w1c[None] + b1c[None], approximate=True)
    hk_gc = jnp.sum(h_c * w2c[None], axis=-1, keepdims=True) + b2c[None]
    score_c = hk_gc * y_c                                           # (B, C, 1)
    score_c = score_c[..., None]                                    # (B, C, 1, 1)
    # spatial branch
    y_s = jnp.mean(y, axis=1, keepdims=True)                        # (B, 1, H, W)
    ys_flat = y_s.reshape(B, 1, H * W)                              # (B, 1, HW)
    h_s = jax.nn.gelu(w1s[None] * ys_flat + b1s[None], approximate=True)
    hk_gs = jnp.sum(h_s * w2s[None], axis=1, keepdims=True) + b2s[None]
    score_s = (hk_gs * ys_flat).reshape(B, 1, H, W)
    score = jax.nn.sigmoid(score_s * score_c)                       # (B, C, H, W)
    return y * score


def make_params(key, hidden):
    ks = jax.random.split(key, 8)
    scale = 0.2
    w1c = scale * jax.random.normal(ks[0], (1, hidden), jnp.float32)
    b1c = scale * jax.random.normal(ks[1], (1, hidden), jnp.float32)
    w2c = scale * jax.random.normal(ks[2], (1, hidden), jnp.float32)
    b2c = scale * jax.random.normal(ks[3], (1, 1), jnp.float32)
    w1s = scale * jax.random.normal(ks[4], (hidden, 1), jnp.float32)
    b1s = scale * jax.random.normal(ks[5], (hidden, 1), jnp.float32)
    w2s = scale * jax.random.normal(ks[6], (hidden, 1), jnp.float32)
    b2s = scale * jax.random.normal(ks[7], (1, 1), jnp.float32)
    return (w1c, b1c, w2c, b2c, w1s, b1s, w2s, b2s)


if __name__ == "__main__":
    B, C, H, W = 2, 8, 16, 16
    hidden = 32

    key = jax.random.PRNGKey(0)
    k_y, k_p, k_y2 = jax.random.split(key, 3)
    params = make_params(k_p, hidden)

    # 1) f32, lane-aligned spatial (HW = 256); f32 compute everywhere.
    y = jax.random.normal(k_y, (B, C, H, W), jnp.float32)
    out = jax.block_until_ready(hyper_interact(y, params))
    ref = hyper_interact_ref(y, params)
    assert out.shape == (B, C, H, W)
    assert jnp.allclose(out, ref, atol=2e-5, rtol=2e-5), "f32 mismatch vs reference"

    # 2) bf16 across HBM (half the DMA bytes); bf16 spatial GELU / gate on
    #    v6e/v7x, f32 on v5e; means and hk accumulation are f32 either way.
    y_bf16 = y.astype(jnp.bfloat16)
    out_bf = jax.block_until_ready(hyper_interact(y_bf16, params))
    ref_bf = hyper_interact_ref(y_bf16.astype(jnp.float32), params)
    assert out_bf.dtype == jnp.bfloat16
    assert jnp.allclose(out_bf.astype(jnp.float32), ref_bf, atol=5e-2, rtol=5e-2), \
        "bf16 mismatch vs reference"

    # 3) non-lane-aligned spatial (14*14=196, no wrapper pad/depad) and a batch
    #    that does not divide the batch tile (ragged last block).
    y_odd = jax.random.normal(k_y2, (3, C, 14, 14), jnp.float32)
    out_odd = jax.block_until_ready(hyper_interact(y_odd, params))
    ref_odd = hyper_interact_ref(y_odd, params)
    assert jnp.allclose(out_odd, ref_odd, atol=2e-5, rtol=2e-5), \
        "unaligned-HW / ragged-batch mismatch"

    print("KERNEL_OK")
</pallas_src>

<mosaic_0001>
module attributes {stable_mosaic.version = 11 : i64} {
  func.func @kernel(%arg0: i32, %arg1: memref<1x8x256xf32, #tpu.memory_space<vmem>>, %arg2: memref<3x32xf32, #tpu.memory_space<vmem>>, %arg3: memref<32x3xf32, #tpu.memory_space<vmem>>, %arg4: memref<2xf32, #tpu.memory_space<smem>>, %arg5: memref<1x8x256xf32, #tpu.memory_space<vmem>>) attributes {dimension_semantics = [#tpu.dimension_semantics<parallel>], iteration_bounds = array<i64: 2>, scalar_prefetch = 0 : i64, scratch_operands = 0 : i64, tpu.core_type = #tpu.core_type<tc>, window_params = [{transform_indices = @transform_0, window_bounds = array<i64: 1, 8, 256>}, {pipeline_mode = #tpu.pipeline_mode<synchronous>, transform_indices = @transform_1, window_bounds = array<i64: 3, 32>}, {pipeline_mode = #tpu.pipeline_mode<synchronous>, transform_indices = @transform_2, window_bounds = array<i64: 32, 3>}, {transform_indices = @transform_3, window_bounds = array<i64: 2>}, {transform_indices = @transform_4, window_bounds = array<i64: 1, 8, 256>}]} {
    %c0 = arith.constant 0 : index
    %0 = memref.load %arg4[%c0] : memref<2xf32, #tpu.memory_space<smem>>
    %c1 = arith.constant 1 : index
    %1 = memref.load %arg4[%c1] : memref<2xf32, #tpu.memory_space<smem>>
    %c0_0 = arith.constant 0 : index
    %c0_1 = arith.constant 0 : index
    %c0_2 = arith.constant 0 : index
    %2 = vector.load %arg1[%c0_0, %c0_1, %c0_2] : memref<1x8x256xf32, #tpu.memory_space<vmem>>, vector<1x8x256xf32>
    %cst = arith.constant dense<0.000000e+00> : vector<1x8xf32>
    %3 = vector.multi_reduction <add>, %2, %cst [2] : vector<1x8x256xf32> to vector<1x8xf32>
    %4 = vector.shape_cast %3 : vector<1x8xf32> to vector<1x8x1xf32>
    %cst_3 = arith.constant 2.560000e+02 : f32
    %5 = vector.broadcast %cst_3 : f32 to vector<1x8x1xf32>
    %6 = arith.divf %4, %5 : vector<1x8x1xf32>
    %c0_4 = arith.constant 0 : index
    %c0_5 = arith.constant 0 : index
    %7 = vector.load %arg2[%c0_4, %c0_5] : memref<3x32xf32, #tpu.memory_space<vmem>>, vector<1x32xf32>
    %c1_6 = arith.constant 1 : index
    %c0_7 = arith.constant 0 : index
    %8 = vector.load %arg2[%c1_6, %c0_7] : memref<3x32xf32, #tpu.memory_space<vmem>>, vector<1x32xf32>
    %c2 = arith.constant 2 : index
    %c0_8 = arith.constant 0 : index
    %9 = vector.load %arg2[%c2, %c0_8] : memref<3x32xf32, #tpu.memory_space<vmem>>, vector<1x32xf32>
    %10 = vector.shape_cast %7 : vector<1x32xf32> to vector<1x1x32xf32>
    %11 = vector.broadcast %6 : vector<1x8x1xf32> to vector<1x8x32xf32>
    %12 = vector.broadcast %10 : vector<1x1x32xf32> to vector<1x8x32xf32>
    %13 = arith.mulf %11, %12 : vector<1x8x32xf32>
    %14 = vector.shape_cast %8 : vector<1x32xf32> to vector<1x1x32xf32>
    %15 = vector.broadcast %14 : vector<1x1x32xf32> to vector<1x8x32xf32>
    %16 = arith.addf %13, %15 : vector<1x8x32xf32>
    %17 = arith.mulf %16, %16 : vector<1x8x32xf32>
    %18 = arith.mulf %16, %17 : vector<1x8x32xf32>
    %cst_9 = arith.constant 4.471500e-02 : f32
    %19 = vector.broadcast %cst_9 : f32 to vector<1x8x32xf32>
    %20 = arith.mulf %19, %18 : vector<1x8x32xf32>
    %21 = arith.addf %16, %20 : vector<1x8x32xf32>
    %cst_10 = arith.constant 0.797884583 : f32
    %22 = vector.broadcast %cst_10 : f32 to vector<1x8x32xf32>
    %23 = arith.mulf %22, %21 : vector<1x8x32xf32>
    %24 = math.tanh %23 : vector<1x8x32xf32>
    %cst_11 = arith.constant 1.000000e+00 : f32
    %25 = vector.broadcast %cst_11 : f32 to vector<1x8x32xf32>
    %26 = arith.addf %25, %24 : vector<1x8x32xf32>
    %cst_12 = arith.constant 5.000000e-01 : f32
    %27 = vector.broadcast %cst_12 : f32 to vector<1x8x32xf32>
    %28 = arith.mulf %27, %26 : vector<1x8x32xf32>
    %29 = arith.mulf %16, %28 : vector<1x8x32xf32>
    %30 = vector.shape_cast %9 : vector<1x32xf32> to vector<1x1x32xf32>
    %31 = vector.broadcast %30 : vector<1x1x32xf32> to vector<1x8x32xf32>
    %32 = arith.mulf %29, %31 : vector<1x8x32xf32>
    %cst_13 = arith.constant dense<0.000000e+00> : vector<1x8xf32>
    %33 = vector.multi_reduction <add>, %32, %cst_13 [2] : vector<1x8x32xf32> to vector<1x8xf32>
    %34 = vector.shape_cast %33 : vector<1x8xf32> to vector<1x8x1xf32>
    %35 = vector.broadcast %0 : f32 to vector<1x8x1xf32>
    %36 = arith.addf %34, %35 : vector<1x8x1xf32>
    %37 = arith.mulf %36, %6 : vector<1x8x1xf32>
    %cst_14 = arith.constant dense<0.000000e+00> : vector<1x256xf32>
    %38 = vector.multi_reduction <add>, %2, %cst_14 [1] : vector<1x8x256xf32> to vector<1x256xf32>
    %39 = vector.shape_cast %38 : vector<1x256xf32> to vector<1x1x256xf32>
    %cst_15 = arith.constant 8.000000e+00 : f32
    %40 = vector.broadcast %cst_15 : f32 to vector<1x1x256xf32>
    %41 = arith.divf %39, %40 : vector<1x1x256xf32>
    %cst_16 = arith.constant 0.000000e+00 : f32
    %42 = vector.broadcast %cst_16 : f32 to vector<1x8x256xf32>
    %c0_17 = arith.constant 0 : index
    %c0_18 = arith.constant 0 : index
    %43 = vector.load %arg3[%c0_17, %c0_18] : memref<32x3xf32, #tpu.memory_space<vmem>>, vector<8x1xf32>
    %44 = vector.shape_cast %43 : vector<8x1xf32> to vector<1x8x1xf32>
    %c0_19 = arith.constant 0 : index
    %c1_20 = arith.constant 1 : index
    %45 = vector.load %arg3[%c0_19, %c1_20] : memref<32x3xf32, #tpu.memory_space<vmem>>, vector<8x1xf32>
    %46 = vector.shape_cast %45 : vector<8x1xf32> to vector<1x8x1xf32>
    %c0_21 = arith.constant 0 : index
    %c2_22 = arith.constant 2 : index
    %47 = vector.load %arg3[%c0_21, %c2_22] : memref<32x3xf32, #tpu.memory_space<vmem>>, vector<8x1xf32>
    %48 = vector.shape_cast %47 : vector<8x1xf32> to vector<1x8x1xf32>
    %49 = vector.broadcast %44 : vector<1x8x1xf32> to vector<1x8x256xf32>
    %50 = vector.broadcast %41 : vector<1x1x256xf32> to vector<1x8x256xf32>
    %51 = arith.mulf %49, %50 : vector<1x8x256xf32>
    %52 = vector.broadcast %46 : vector<1x8x1xf32> to vector<1x8x256xf32>
    %53 = arith.addf %51, %52 : vector<1x8x256xf32>
    %54 = arith.mulf %53, %53 : vector<1x8x256xf32>
    %55 = arith.mulf %53, %54 : vector<1x8x256xf32>
    %cst_23 = arith.constant 4.471500e-02 : f32
    %56 = vector.broadcast %cst_23 : f32 to vector<1x8x256xf32>
    %57 = arith.mulf %56, %55 : vector<1x8x256xf32>
    %58 = arith.addf %53, %57 : vector<1x8x256xf32>
    %cst_24 = arith.constant 0.797884583 : f32
    %59 = vector.broadcast %cst_24 : f32 to vector<1x8x256xf32>
    %60 = arith.mulf %59, %58 : vector<1x8x256xf32>
    %61 = math.tanh %60 : vector<1x8x256xf32>
    %cst_25 = arith.constant 1.000000e+00 : f32
    %62 = vector.broadcast %cst_25 : f32 to vector<1x8x256xf32>
    %63 = arith.addf %62, %61 : vector<1x8x256xf32>
    %cst_26 = arith.constant 5.000000e-01 : f32
    %64 = vector.broadcast %cst_26 : f32 to vector<1x8x256xf32>
    %65 = arith.mulf %64, %63 : vector<1x8x256xf32>
    %66 = arith.mulf %53, %65 : vector<1x8x256xf32>
    %67 = vector.broadcast %48 : vector<1x8x1xf32> to vector<1x8x256xf32>
    %68 = arith.mulf %66, %67 : vector<1x8x256xf32>
    %69 = arith.addf %42, %68 : vector<1x8x256xf32>
    %c8 = arith.constant 8 : index
    %c0_27 = arith.constant 0 : index
    %70 = vector.load %arg3[%c8, %c0_27] : memref<32x3xf32, #tpu.memory_space<vmem>>, vector<8x1xf32>
    %71 = vector.shape_cast %70 : vector<8x1xf32> to vector<1x8x1xf32>
    %c8_28 = arith.constant 8 : index
    %c1_29 = arith.constant 1 : index
    %72 = vector.load %arg3[%c8_28, %c1_29] : memref<32x3xf32, #tpu.memory_space<vmem>>, vector<8x1xf32>
    %73 = vector.shape_cast %72 : vector<8x1xf32> to vector<1x8x1xf32>
    %c8_30 = arith.constant 8 : index
    %c2_31 = arith.constant 2 : index
    %74 = vector.load %arg3[%c8_30, %c2_31] : memref<32x3xf32, #tpu.memory_space<vmem>>, vector<8x1xf32>
    %75 = vector.shape_cast %74 : vector<8x1xf32> to vector<1x8x1xf32>
    %76 = vector.broadcast %71 : vector<1x8x1xf32> to vector<1x8x256xf32>
    %77 = vector.broadcast %41 : vector<1x1x256xf32> to vector<1x8x256xf32>
    %78 = arith.mulf %76, %77 : vector<1x8x256xf32>
    %79 = vector.broadcast %73 : vector<1x8x1xf32> to vector<1x8x256xf32>
    %80 = arith.addf %78, %79 : vector<1x8x256xf32>
    %81 = arith.mulf %80, %80 : vector<1x8x256xf32>
    %82 = arith.mulf %80, %81 : vector<1x8x256xf32>
    %cst_32 = arith.constant 4.471500e-02 : f32
    %83 = vector.broadcast %cst_32 : f32 to vector<1x8x256xf32>
    %84 = arith.mulf %83, %82 : vector<1x8x256xf32>
    %85 = arith.addf %80, %84 : vector<1x8x256xf32>
    %cst_33 = arith.constant 0.797884583 : f32
    %86 = vector.broadcast %cst_33 : f32 to vector<1x8x256xf32>
    %87 = arith.mulf %86, %85 : vector<1x8x256xf32>
    %88 = math.tanh %87 : vector<1x8x256xf32>
    %cst_34 = arith.constant 1.000000e+00 : f32
    %89 = vector.broadcast %cst_34 : f32 to vector<1x8x256xf32>
    %90 = arith.addf %89, %88 : vector<1x8x256xf32>
    %cst_35 = arith.constant 5.000000e-01 : f32
    %91 = vector.broadcast %cst_35 : f32 to vector<1x8x256xf32>
    %92 = arith.mulf %91, %90 : vector<1x8x256xf32>
    %93 = arith.mulf %80, %92 : vector<1x8x256xf32>
    %94 = vector.broadcast %75 : vector<1x8x1xf32> to vector<1x8x256xf32>
    %95 = arith.mulf %93, %94 : vector<1x8x256xf32>
    %96 = arith.addf %69, %95 : vector<1x8x256xf32>
    %c16 = arith.constant 16 : index
    %c0_36 = arith.constant 0 : index
    %97 = vector.load %arg3[%c16, %c0_36] : memref<32x3xf32, #tpu.memory_space<vmem>>, vector<8x1xf32>
    %98 = vector.shape_cast %97 : vector<8x1xf32> to vector<1x8x1xf32>
    %c16_37 = arith.constant 16 : index
    %c1_38 = arith.constant 1 : index
    %99 = vector.load %arg3[%c16_37, %c1_38] : memref<32x3xf32, #tpu.memory_space<vmem>>, vector<8x1xf32>
    %100 = vector.shape_cast %99 : vector<8x1xf32> to vector<1x8x1xf32>
    %c16_39 = arith.constant 16 : index
    %c2_40 = arith.constant 2 : index
    %101 = vector.load %arg3[%c16_39, %c2_40] : memref<32x3xf32, #tpu.memory_space<vmem>>, vector<8x1xf32>
    %102 = vector.shape_cast %101 : vector<8x1xf32> to vector<1x8x1xf32>
    %103 = vector.broadcast %98 : vector<1x8x1xf32> to vector<1x8x256xf32>
    %104 = vector.broadcast %41 : vector<1x1x256xf32> to vector<1x8x256xf32>
    %105 = arith.mulf %103, %104 : vector<1x8x256xf32>
    %106 = vector.broadcast %100 : vector<1x8x1xf32> to vector<1x8x256xf32>
    %107 = arith.addf %105, %106 : vector<1x8x256xf32>
    %108 = arith.mulf %107, %107 : vector<1x8x256xf32>
    %109 = arith.mulf %107, %108 : vector<1x8x256xf32>
    %cst_41 = arith.constant 4.471500e-02 : f32
    %110 = vector.broadcast %cst_41 : f32 to vector<1x8x256xf32>
    %111 = arith.mulf %110, %109 : vector<1x8x256xf32>
    %112 = arith.addf %107, %111 : vector<1x8x256xf32>
    %cst_42 = arith.constant 0.797884583 : f32
    %113 = vector.broadcast %cst_42 : f32 to vector<1x8x256xf32>
    %114 = arith.mulf %113, %112 : vector<1x8x256xf32>
    %115 = math.tanh %114 : vector<1x8x256xf32>
    %cst_43 = arith.constant 1.000000e+00 : f32
    %116 = vector.broadcast %cst_43 : f32 to vector<1x8x256xf32>
    %117 = arith.addf %116, %115 : vector<1x8x256xf32>
    %cst_44 = arith.constant 5.000000e-01 : f32
    %118 = vector.broadcast %cst_44 : f32 to vector<1x8x256xf32>
    %119 = arith.mulf %118, %117 : vector<1x8x256xf32>
    %120 = arith.mulf %107, %119 : vector<1x8x256xf32>
    %121 = vector.broadcast %102 : vector<1x8x1xf32> to vector<1x8x256xf32>
    %122 = arith.mulf %120, %121 : vector<1x8x256xf32>
    %123 = arith.addf %96, %122 : vector<1x8x256xf32>
    %c24 = arith.constant 24 : index
    %c0_45 = arith.constant 0 : index
    %124 = vector.load %arg3[%c24, %c0_45] : memref<32x3xf32, #tpu.memory_space<vmem>>, vector<8x1xf32>
    %125 = vector.shape_cast %124 : vector<8x1xf32> to vector<1x8x1xf32>
    %c24_46 = arith.constant 24 : index
    %c1_47 = arith.constant 1 : index
    %126 = vector.load %arg3[%c24_46, %c1_47] : memref<32x3xf32, #tpu.memory_space<vmem>>, vector<8x1xf32>
    %127 = vector.shape_cast %126 : vector<8x1xf32> to vector<1x8x1xf32>
    %c24_48 = arith.constant 24 : index
    %c2_49 = arith.constant 2 : index
    %128 = vector.load %arg3[%c24_48, %c2_49] : memref<32x3xf32, #tpu.memory_space<vmem>>, vector<8x1xf32>
    %129 = vector.shape_cast %128 : vector<8x1xf32> to vector<1x8x1xf32>
    %130 = vector.broadcast %125 : vector<1x8x1xf32> to vector<1x8x256xf32>
    %131 = vector.broadcast %41 : vector<1x1x256xf32> to vector<1x8x256xf32>
    %132 = arith.mulf %130, %131 : vector<1x8x256xf32>
    %133 = vector.broadcast %127 : vector<1x8x1xf32> to vector<1x8x256xf32>
    %134 = arith.addf %132, %133 : vector<1x8x256xf32>
    %135 = arith.mulf %134, %134 : vector<1x8x256xf32>
    %136 = arith.mulf %134, %135 : vector<1x8x256xf32>
    %cst_50 = arith.constant 4.471500e-02 : f32
    %137 = vector.broadcast %cst_50 : f32 to vector<1x8x256xf32>
    %138 = arith.mulf %137, %136 : vector<1x8x256xf32>
    %139 = arith.addf %134, %138 : vector<1x8x256xf32>
    %cst_51 = arith.constant 0.797884583 : f32
    %140 = vector.broadcast %cst_51 : f32 to vector<1x8x256xf32>
    %141 = arith.mulf %140, %139 : vector<1x8x256xf32>
    %142 = math.tanh %141 : vector<1x8x256xf32>
    %cst_52 = arith.constant 1.000000e+00 : f32
    %143 = vector.broadcast %cst_52 : f32 to vector<1x8x256xf32>
    %144 = arith.addf %143, %142 : vector<1x8x256xf32>
    %cst_53 = arith.constant 5.000000e-01 : f32
    %145 = vector.broadcast %cst_53 : f32 to vector<1x8x256xf32>
    %146 = arith.mulf %145, %144 : vector<1x8x256xf32>
    %147 = arith.mulf %134, %146 : vector<1x8x256xf32>
    %148 = vector.broadcast %129 : vector<1x8x1xf32> to vector<1x8x256xf32>
    %149 = arith.mulf %147, %148 : vector<1x8x256xf32>
    %150 = arith.addf %123, %149 : vector<1x8x256xf32>
    %cst_54 = arith.constant dense<0.000000e+00> : vector<1x256xf32>
    %151 = vector.multi_reduction <add>, %150, %cst_54 [1] : vector<1x8x256xf32> to vector<1x256xf32>
    %152 = vector.shape_cast %151 : vector<1x256xf32> to vector<1x1x256xf32>
    %153 = vector.broadcast %1 : f32 to vector<1x1x256xf32>
    %154 = arith.addf %152, %153 : vector<1x1x256xf32>
    %155 = arith.mulf %154, %41 : vector<1x1x256xf32>
    %156 = vector.broadcast %155 : vector<1x1x256xf32> to vector<1x8x256xf32>
    %157 = vector.broadcast %37 : vector<1x8x1xf32> to vector<1x8x256xf32>
    %158 = arith.mulf %156, %157 : vector<1x8x256xf32>
    %cst_55 = arith.constant 5.000000e-01 : f32
    %159 = vector.broadcast %cst_55 : f32 to vector<1x8x256xf32>
    %160 = arith.mulf %159, %158 : vector<1x8x256xf32>
    %161 = math.tanh %160 : vector<1x8x256xf32>
    %cst_56 = arith.constant 1.000000e+00 : f32
    %162 = vector.broadcast %cst_56 : f32 to vector<1x8x256xf32>
    %163 = arith.addf %161, %162 : vector<1x8x256xf32>
    %cst_57 = arith.constant 5.000000e-01 : f32
    %164 = vector.broadcast %cst_57 : f32 to vector<1x8x256xf32>
    %165 = arith.mulf %164, %163 : vector<1x8x256xf32>
    %166 = arith.mulf %2, %165 : vector<1x8x256xf32>
    %c0_58 = arith.constant 0 : index
    %c0_59 = arith.constant 0 : index
    %c0_60 = arith.constant 0 : index
    %167 = vector.load %arg5[%c0_58, %c0_59, %c0_60] : memref<1x8x256xf32, #tpu.memory_space<vmem>>, vector<1x8x256xf32>
    tpu.vector_store %arg5[%c0_58, %c0_59, %c0_60], %166 {strides = array<i32>} : memref<1x8x256xf32, #tpu.memory_space<vmem>>, vector<1x8x256xf32>,
    return
  }
  func.func @transform_0(%arg0: i32) -> (i32, i32, i32) {
    %c0_i32 = arith.constant 0 : i32
    %c0_i32_0 = arith.constant 0 : i32
    %c0_i32_1 = arith.constant 0 : i32
    return %arg0, %c0_i32, %c0_i32_0 : i32, i32, i32
  }
  func.func @transform_1(%arg0: i32) -> (i32, i32) {
    %c0_i32 = arith.constant 0 : i32
    %c0_i32_0 = arith.constant 0 : i32
    %c0_i32_1 = arith.constant 0 : i32
    return %c0_i32, %c0_i32_0 : i32, i32
  }
  func.func @transform_2(%arg0: i32) -> (i32, i32) {
    %c0_i32 = arith.constant 0 : i32
    %c0_i32_0 = arith.constant 0 : i32
    %c0_i32_1 = arith.constant 0 : i32
    return %c0_i32, %c0_i32_0 : i32, i32
  }
  func.func @transform_3(%arg0: i32) -> i32 {
    %c0_i32 = arith.constant 0 : i32
    %c0_i32_0 = arith.constant 0 : i32
    return %c0_i32 : i32
  }
  func.func @transform_4(%arg0: i32) -> (i32, i32, i32) {
    %c0_i32 = arith.constant 0 : i32
    %c0_i32_0 = arith.constant 0 : i32
    %c0_i32_1 = arith.constant 0 : i32
    return %arg0, %c0_i32, %c0_i32_0 : i32, i32, i32
  }
}

</mosaic_0001>

<bundles_post_ra>
// kernel: tpu_custom_call.1
= control target key start
LH: loop header
LB: loop body
LE: loop exit
PB: predicated region body
PF: predicated region fallthrough
CT: control target
= control target key end

     0   :  { %9 = vsyncpa [#allocation4], 0  ;;  %s978_s0 = inlined_call_operand.vmem [shape: f32[2,8,256], index: 0, kind: input, shape index: {}]   ;;  %s979_s1 = inlined_call_operand.vmem [shape: f32[3,32], index: 1, kind: input, shape index: {}]   ;;  %s980_s2 = inlined_call_operand.vmem [shape: f32[32,3], index: 2, kind: input, shape index: {}]   ;;  %s981_s3 = inlined_call_operand.vmem [shape: f32[2], index: 3, kind: input, shape index: {}]   ;;  %s982_s4 = inlined_call_operand.hbm [shape: f32[2,8,256], index: 4, kind: output, shape index: {}]  }
   0x1   :  { %10 = vsyncpa [#allocation3], 0 }
   0x2   :  { %12 = vsyncpa [#allocation3 + $0x1], 0  ;;  %s760_s15 = smov 0   ;;  %s762_s16 = smov 0  }
   0x3   :  { %s764_s17 = smov 0   ;;  %s766_s18 = smov 0  }
   0x4 LB: > { %s781_s19 = sadd.s32 4294967295, %s728_s18   ;;  %s545_s20 = sadd.s32 4294967294, %s728_s18   ;;  %s728_s18 = sphi %s766_s18, %s989_s18   ;;  %s724_s17 = sphi %s764_s17, %s988_s17   ;;  %s720_s16 = sphi %s762_s16, %s987_s16   ;;  %s716_s15 = sphi %s760_s15, %s986_s15  }
   0x5   : > { %s785_s21 = sadd.s32 1, %s728_s18   ;;  %s114_s22 = sadd.s32 1, %s724_s17 }
   0x6   : > { %s111_s23 = ssub.s32 %s728_s18, %s785_s21  ;;  %p124_p0 = scmp.ne.s32.totalorder %s724_s17, %s720_s16 }
   0x7   : > { %p112_p1 = scmp.eq.s32.totalorder %s111_s23, 0  ;;  %p125_p2 = scmp.eq.s32.totalorder %s781_s19, 1 }
   0x8   : > { %p130_p3 = scmp.ne.s32.totalorder %s720_s16, %s716_s15  ;;  %p131_p4 = scmp.eq.s32.totalorder %s545_s20, 1 }
   0x9   : > { %s796_s24 = scalar_select %p112_p1, %s724_s17, %s114_s22  }
   0xa   : > { %p798_p5 = por %p125_p2, %p124_p0  ;;  %p802_p6 = por %p131_p4, %p130_p3 }
   0xb   : > { %p546_p7 = scmp.ge.s32.totalorder %s728_s18, 1  ;;  %p138_p8 = scmp.lt.s32.totalorder %s728_s18, 3 }
   0xc   : > { %p579_p9 = scmp.eq.s32.totalorder %s781_s19, 0  ;;  %s157_s30 = sshll.u32 %s981_s3, 4  ;;  %s158_s30 = int_to_ptr.vmem [resolvable:$true] %s157_s30 }
   0xd   : > { %p809_p10 = pnand %p546_p7, %p138_p8  ;;  %s649_s5 = scalar_lea.vmem %s158_s30, 16 }
   0xe   : > { %p650_p13 = scmp.ne.s32.totalorder %s158_s30, %s649_s5  ;;  %p657_p3 = scmp.lt.s32.totalorder %s158_s30, %s158_s30 }
   0xf   : > { %p571_p11 = pneg %p809_p10  ;;  %p658_p4 = scmp.lt.s32.totalorder %s649_s5, %s649_s5 }
  0x11   : > { %p572_p12 = pnand %p579_p9, %p571_p11  ;;  %p659_p7 = por %p658_p4, %p657_p3 }
  0x13   : > { %p651_p0 = pneg %p572_p12 }
  0x15   : > { %p652_p1 = pnand %p651_p0, %p650_p13 }
  0x17   : > { %p653_p2 = pneg %p652_p1 }
  0x19   : > { %p660_p8 = pnand %p659_p7, %p653_p2 }
  0x1b   : > { %663 = shalt.err (!%p660_p8)
}
  0x1c   : > { %s730_s6 = smov [#allocation2]   ;;  %178 = sbr.rel (%p809_p10) target bundleno = 402 (0x192), region = 36 }
  0x1d   : > { %574 = dma.vmem_to_smem (!%p572_p12), %s158_s30, 16, %s730_s6, [#allocation4]  }
  0x21   : > { %707 = dma.done.wait (%p579_p9), [#allocation4], 16  }
  0x22   : > { %709 = vsyncadd (%p579_p9), [#allocation4], 4294967280 }
  0x23   : > { %184 = sfence }
  0x24   : > { %p205_p11 = scmp.lt.s32.totalorder %s781_s19, 1  ;;  %v308_v0 = vld [vmem:[%s980_s2 + $0x8] sm:$0xff]  ;;  %v731_v1 = vmov 0   ;;  %v268_v2 = vld [vmem:[%s980_s2] sm:$0xff]  ;;  %v732_v5 = vmov 1   ;;  %v348_v7 = vld [vmem:[%s980_s2 + $0x10] sm:$0xff] }
  0x25   : > { %619 = vset.pattern.permute.xlu1 %v731_v1  ;;  %618 = vset.pattern.permute.xlu0 %v731_v1  ;;  %v388_v8 = vld [vmem:[%s980_s2 + $0x18] sm:$0xff]  ;;  %v733_v9 = vmov 2   ;;  %v555_v10 = vld [vmem:[%s979_s1] ss:$0 sm:$0xff]  ;;  %v556_v13 = vld [vmem:[%s979_s1 + $0x1] ss:$0 sm:$0xff] }
  0x26   : > { %s206_s9 = scalar_select %p205_p11, %s781_s19, 1  ;;  %311 = vperm.xlu1 %619, %v308_v0   ;;  %v557_v24 = vld [vmem:[%s979_s1 + $0x2] ss:$0 sm:$0xff]  ;;  %vm246_vm0 = vcmask 261120  }
  0x27   : > { %s202_s11 = sand.u32 1, %s720_s16   ;;  %s564_s13 = sshll.u32 %s781_s19, 8 }
  0x28   : > { %s563_s10 = sshll.u32 %s206_s9, 4  ;;  %s554_s9 = sld [smem:[#allocation2 + $0x1]] }
  0x29   : > { %s209_s20 = scalar_lea.vmem %s978_s0, %s563_s10  ;;  %s210_s10 = sld [smem:[#allocation2]] }
  0x2a   : > { %v837_v3 = vld [vmem:[%s209_s20] sm:$0xff]  ;;  %v839_v4 = vld [vmem:[%s209_s20 + $0x8] sm:$0xff]  ;;  %620 = vset.pattern.permute.xlu1 %v732_v5  ;;  %s551_s12 = sshll.u32 %s202_s11, 4  ;;  %s943_s27 = scalar_lea.hbm %s982_s4, %s564_s13 }
  0x2b   : > { %v214_v6 = vadd.f32 %v839_v4, %v837_v3  ;;  %277 = vperm.xlu1 %620, %v268_v2   ;;  %v253_v28 = vrot.slane %v837_v3, 4  ;;  %v259_v29 = vrot.slane %v839_v4, 4  ;;  %s204_s14 = scalar_lea.vmem [#allocation5], %s551_s12  ;;  %s460_s28 = scalar_lea.sflag [#allocation3], %s202_s11 }
  0x2c   : > { %s474_s20 = sshll.u32 %s204_s14, 4  ;;  %s734_s19 = smov [#allocation5]   ;;  %s475_s20 = int_to_ptr.vmem [resolvable:$true] %s474_s20 }
  0x2d   : > { %215 = vadd.xlane.f32.xlu0 %v214_v6  ;;  %v254_v31 = vadd.f32 %v253_v28, %v837_v3  ;;  %v260_v32 = vadd.f32 %v259_v29, %v839_v4  ;;  %s664_s29 = scalar_lea.vmem %s475_s20, 256  ;;  %s668_s30 = sshll.u32 %s734_s19, 4  ;;  %s669_s30 = int_to_ptr.vmem [resolvable:$false] %s668_s30 }
  0x2e   : > { %p665_p9 = scmp.ne.s32.totalorder %s475_s20, %s664_s29  ;;  %s670_s5 = scalar_lea.vmem %s669_s30, 512 }
  0x2f   : > { %317 = vperm.xlu1 %620, %v308_v0   ;;  %v255_v33 = vrot.slane %v254_v31, 2  ;;  %v261_v34 = vrot.slane %v260_v32, 2  ;;  %p671_p13 = scmp.lt.s32.totalorder %s475_s20, %s669_s30  ;;  %p672_p0 = scmp.lt.s32.totalorder %s670_s5, %s664_s29 }
  0x30   : > { %p666_p10 = pnand %p665_p9, %p798_p5 }
  0x31   : > { %v256_v36 = vadd.f32 %v255_v33, %v254_v31  ;;  %v262_v37 = vadd.f32 %v261_v34, %v260_v32  ;;  %p673_p1 = por %p672_p0, %p671_p13 }
  0x32   : > { %p667_p12 = pneg %p666_p10 }
  0x33   : > { %621 = vset.pattern.permute.xlu1 %v731_v1  ;;  %v257_v39 = vrot.slane %v256_v36, 1  ;;  %v263_v40 = vrot.slane %v262_v37, 1 }
  0x34   : > { %351 = vperm.xlu1 %621, %v348_v7   ;;  %p674_p2 = pnand %p673_p1, %p667_p12 }
  0x35   : > { %v258_v41 = vadd.f32 %v257_v39, %v256_v36  ;;  %v264_v42 = vadd.f32 %v263_v40, %v262_v37 }
  0x37   : > { %v865_v44 = vmul.f32 0.125, %v258_v41  ;;  %v867_v45 = vmul.f32 0.125, %v264_v42 }
  0x38   : > { %622 = vset.pattern.permute.xlu1 %v732_v5 }
  0x39   : > { %357 = vperm.xlu1 %622, %v348_v7  }
  0x3d   : > { %623 = vset.pattern.permute.xlu1 %v731_v1 }
  0x3e   : > { %391 = vperm.xlu1 %623, %v388_v8  }
  0x42   : > { %624 = vset.pattern.permute.xlu1 %v732_v5 }
  0x43   : > { %271 = vperm.xlu0 %618, %v268_v2   ;;  %397 = vperm.xlu1 %624, %v388_v8  }
  0x47   : > { %625 = vset.pattern.permute.xlu1 %v733_v9  ;;  %626 = vset.pattern.permute.xlu0 %v733_v9 }
  0x48   : > { %301 = vperm.xlu1 %625, %v268_v2  }
  0x4c   : > { %341 = vperm.xlu1 %625, %v308_v0  }
  0x50   : > { %381 = vperm.xlu1 %625, %v348_v7  }
  0x54   : > { %421 = vperm.xlu1 %625, %v388_v8  }
  0xa1   : > { %v312_v30 = vpop.permute.xlu1 %311 }
  0xa2   : > { %v314_v48 = vmul.f32 %v312_v30, %v865_v44  ;;  %v315_v49 = vmul.f32 %v312_v30, %v867_v45 }
  0xa6   : > { %v278_v35 = vpop.permute.xlu1 %277 }
  0xaa   : > { %v318_v38 = vpop.permute.xlu1 %317 }
  0xab   : > { %v873_v52 = vadd.f32 %v318_v38, %v314_v48  ;;  %v875_v53 = vadd.f32 %v318_v38, %v315_v49 }
  0xad   : > { %v322_v59 = vmul.f32 %v873_v52, %v873_v52  ;;  %v323_v60 = vmul.f32 %v875_v53, %v875_v53 }
  0xaf   : > { %v352_v43 = vpop.permute.xlu1 %351  ;;  %v324_v6 = vmul.f32 %v322_v59, %v873_v52  ;;  %v325_v7 = vmul.f32 %v323_v60, %v875_v53 }
  0xb0   : > { %v354_v54 = vmul.f32 %v352_v43, %v865_v44  ;;  %v355_v56 = vmul.f32 %v352_v43, %v867_v45 }
  0xb4   : > { %v358_v46 = vpop.permute.xlu1 %357 }
  0xb5   : > { %v887_v61 = vadd.f32 %v358_v46, %v354_v54  ;;  %v889_v62 = vadd.f32 %v358_v46, %v355_v56 }
  0xb6   : > { %v216_v11 = vpop.xlane.xlu0 %215 }
  0xb7   : > { %v852_v12 = vmul.f32 0.00390625, %v216_v11  ;;  %v362_v8 = vmul.f32 %v887_v61, %v887_v61  ;;  %v363_v9 = vmul.f32 %v889_v62, %v889_v62 }
  0xb9   : > { %v226_v14 = vmul.f32 %v555_v10, %v852_v12  ;;  %v392_v55 = vpop.permute.xlu1 %391 }
  0xba   : > { %v394_v0 = vmul.f32 %v392_v55, %v865_v44  ;;  %v395_v2 = vmul.f32 %v392_v55, %v867_v45 }
  0xbb   : > { %v231_v15 = vadd.f32 %v556_v13, %v226_v14 }
  0xbd   : > { %v232_v16 = vmul.f32 %v231_v15, %v231_v15 }
  0xbe   : > { %v272_v47 = vpop.permute.xlu0 %271  ;;  %v398_v5 = vpop.permute.xlu1 %397 }
  0xbf   : > { %v233_v17 = vmul.f32 %v232_v16, %v231_v15  ;;  %v274_v50 = vmul.f32 %v272_v47, %v865_v44  ;;  %v275_v51 = vmul.f32 %v272_v47, %v867_v45  ;;  %v904_v11 = vadd.f32 %v398_v5, %v394_v0 }
  0xc0   : > { %v907_v14 = vadd.f32 %v398_v5, %v395_v2  ;;  %v327_v16 = vmul.f32 0.044715, %v325_v7 }
  0xc1   : > { %v234_v18 = vmul.f32 0.044715, %v233_v17  ;;  %v879_v57 = vadd.f32 %v278_v35, %v274_v50  ;;  %v881_v58 = vadd.f32 %v278_v35, %v275_v51  ;;  %v364_v17 = vmul.f32 %v362_v8, %v887_v61 }
  0xc3   : > { %v235_v19 = vadd.f32 %v234_v18, %v231_v15  ;;  %v282_v63 = vmul.f32 %v879_v57, %v879_v57  ;;  %v283_v1 = vmul.f32 %v881_v58, %v881_v58  ;;  %v365_v18 = vmul.f32 %v363_v9, %v889_v62  ;;  %v302_v54 = vpop.permute.xlu1 %301 }
  0xc5   : > { %v236_v20 = vmul.f32 0.7978846, %v235_v19  ;;  %v284_v10 = vmul.f32 %v282_v63, %v879_v57  ;;  %v285_v13 = vmul.f32 %v283_v1, %v881_v58 }
  0xc7   : > { %627 = vtanh.f32 %v236_v20  ;;  %v286_v19 = vmul.f32 0.044715, %v284_v10  ;;  %v402_v20 = vmul.f32 %v904_v11, %v904_v11  ;;  %v342_v10 = vpop.permute.xlu1 %341 }
  0xc9   : > { %v404_v28 = vmul.f32 %v402_v20, %v904_v11 }
  0xcb   : > { %v406_v35 = vmul.f32 0.044715, %v404_v28 }
  0xcd   : > { %v408_v40 = vadd.f32 %v406_v35, %v904_v11 }
  0xcf   : > { %v410_v43 = vmul.f32 0.7978846, %v408_v40 }
  0xd4   : > { %v628_v21 = vpop.eup %627 }
  0xd5   : > { %v238_v22 = vadd.f32 1.0, %v628_v21  ;;  %v287_v21 = vmul.f32 0.044715, %v285_v13 }
  0xd7   : > { %v239_v23 = vmul.f32 0.5, %v238_v22  ;;  %v403_v22 = vmul.f32 %v907_v14, %v907_v14  ;;  %v289_v29 = vadd.f32 %v287_v21, %v881_v58 }
  0xd9   : > { %v240_v25 = vmul.f32 %v239_v23, %v231_v15  ;;  %v326_v15 = vmul.f32 0.044715, %v324_v6  ;;  %v405_v30 = vmul.f32 %v403_v22, %v907_v14  ;;  %v291_v38 = vmul.f32 0.7978846, %v289_v29 }
  0xdb   : > { %v245_v26 = vmul.f32 %v557_v24, %v240_v25  ;;  %v328_v23 = vadd.f32 %v326_v15, %v873_v52  ;;  %v329_v24 = vadd.f32 %v327_v16, %v875_v53  ;;  %v366_v25 = vmul.f32 0.044715, %v364_v17 }
  0xdc   : > { %v407_v37 = vmul.f32 0.044715, %v405_v30 }
  0xdd   : > { %v247_v27 = vsel %vm246_vm0, %v245_v26, 0.0  ;;  %v367_v26 = vmul.f32 0.044715, %v365_v18  ;;  %v330_v31 = vmul.f32 0.7978846, %v328_v23  ;;  %v368_v32 = vadd.f32 %v366_v25, %v887_v61 }
  0xde   : > { %248 = vadd.xlane.f32.xlu1 %v247_v27  ;;  %v288_v27 = vadd.f32 %v286_v19, %v879_v57  ;;  %v331_v33 = vmul.f32 0.7978846, %v329_v24  ;;  %v409_v42 = vadd.f32 %v407_v37, %v907_v14  ;;  %v382_v24 = vpop.permute.xlu1 %381 }
  0xdf   : > { %v369_v34 = vadd.f32 %v367_v26, %v889_v62  ;;  %629 = vtanh.f32 %v330_v31  ;;  %v370_v39 = vmul.f32 0.7978846, %v368_v32 }
  0xe0   : > { %v290_v36 = vmul.f32 0.7978846, %v288_v27  ;;  %631 = vtanh.f32 %v331_v33  ;;  %v411_v46 = vmul.f32 0.7978846, %v409_v42 }
  0xe1   : > { %v371_v41 = vmul.f32 0.7978846, %v369_v34 }
  0xe2   : > { %633 = vtanh.f32 %v290_v36  ;;  %v422_v33 = vpop.permute.xlu1 %421 }
  0xe3   : > { %635 = vtanh.f32 %v291_v38 }
  0xe4   : > { %637 = vtanh.f32 %v370_v39 }
  0xe5   : > { %639 = vtanh.f32 %v371_v41 }
  0xe6   : > { %641 = vtanh.f32 %v410_v43 }
  0xe7   : > { %643 = vtanh.f32 %v411_v46 }
  0xec   : > { %v630_v47 = vpop.eup %629 }
  0xed   : > { %v632_v48 = vpop.eup %631  ;;  %v334_v55 = vadd.f32 1.0, %v630_v47 }
  0xee   : > { %v335_v56 = vadd.f32 1.0, %v632_v48 }
  0xef   : > { %v634_v49 = vpop.eup %633  ;;  %v336_v0 = vmul.f32 0.5, %v334_v55 }
  0xf0   : > { %v636_v50 = vpop.eup %635  ;;  %v294_v60 = vadd.f32 1.0, %v634_v49  ;;  %v337_v1 = vmul.f32 0.5, %v335_v56 }
  0xf1   : > { %v638_v51 = vpop.eup %637  ;;  %v295_v63 = vadd.f32 1.0, %v636_v50  ;;  %v338_v13 = vmul.f32 %v336_v0, %v873_v52  ;;  %v440_v50 = vstv %s554_s9 }
  0xf2   : > { %v640_v59 = vpop.eup %639  ;;  %v374_v2 = vadd.f32 1.0, %v638_v51  ;;  %v296_v7 = vmul.f32 0.5, %v294_v60  ;;  %v339_v15 = vmul.f32 %v337_v1, %v875_v53  ;;  %v250_v51 = vstv %s210_s10 }
  0xf3   : > { %v375_v5 = vadd.f32 1.0, %v640_v59  ;;  %v642_v6 = vpop.eup %641  ;;  %v297_v8 = vmul.f32 0.5, %v295_v63  ;;  %v344_v22 = vmul.f32 %v342_v10, %v338_v13 }
  0xf4   : > { %v644_v9 = vpop.eup %643  ;;  %v376_v16 = vmul.f32 0.5, %v374_v2  ;;  %v298_v18 = vmul.f32 %v296_v7, %v879_v57  ;;  %v414_v20 = vadd.f32 1.0, %v642_v6  ;;  %v345_v23 = vmul.f32 %v342_v10, %v339_v15 }
  0xf5   : > { %v377_v17 = vmul.f32 0.5, %v375_v5  ;;  %v299_v19 = vmul.f32 %v297_v8, %v881_v58  ;;  %v415_v21 = vadd.f32 1.0, %v644_v9 }
  0xf6   : > { %v378_v25 = vmul.f32 %v376_v16, %v887_v61  ;;  %v304_v27 = vmul.f32 %v302_v54, %v298_v18  ;;  %v416_v52 = vmul.f32 0.5, %v414_v20 }
  0xf7   : > { %v379_v26 = vmul.f32 %v377_v17, %v889_v62  ;;  %v305_v28 = vmul.f32 %v302_v54, %v299_v19  ;;  %v417_v29 = vmul.f32 0.5, %v415_v21 }
  0xf8   : > { %v384_v53 = vmul.f32 %v382_v24, %v378_v25  ;;  %v346_v31 = vadd.f32 %v344_v22, %v304_v27  ;;  %v418_v57 = vmul.f32 %v416_v52, %v904_v11 }
  0xf9   : > { %v385_v30 = vmul.f32 %v382_v24, %v379_v26  ;;  %v347_v32 = vadd.f32 %v345_v23, %v305_v28  ;;  %v419_v58 = vmul.f32 %v417_v29, %v907_v14 }
  0xfa   : > { %v386_v34 = vadd.f32 %v384_v53, %v346_v31  ;;  %v424_v36 = vmul.f32 %v422_v33, %v418_v57 }
  0xfb   : > { %v387_v35 = vadd.f32 %v385_v30, %v347_v32  ;;  %v425_v37 = vmul.f32 %v422_v33, %v419_v58 }
  0xfc   : > { %v426_v61 = vadd.f32 %v424_v36, %v386_v34 }
  0xfd   : > { %v427_v38 = vadd.f32 %v425_v37, %v387_v35 }
  0xfe   : > { %v428_v62 = vrot.slane %v426_v61, 4 }
  0xff   : > { %v434_v39 = vrot.slane %v427_v38, 4 }
 0x100   : > { %v429_v40 = vadd.f32 %v428_v62, %v426_v61 }
 0x101   : > { %v435_v41 = vadd.f32 %v434_v39, %v427_v38 }
 0x102   : > { %v430_v42 = vrot.slane %v429_v40, 2 }
 0x103   : > { %v436_v43 = vrot.slane %v435_v41, 2 }
 0x104   : > { %v431_v46 = vadd.f32 %v430_v42, %v429_v40 }
 0x105   : > { %v437_v47 = vadd.f32 %v436_v43, %v435_v41 }
 0x106   : > { %v432_v11 = vrot.slane %v431_v46, 1 }
 0x107   : > { %v438_v48 = vrot.slane %v437_v47, 1 }
 0x108   : > { %v433_v14 = vadd.f32 %v432_v11, %v431_v46 }
 0x109   : > { %v439_v49 = vadd.f32 %v438_v48, %v437_v47 }
 0x10a   : > { %v441_v54 = vadd.f32 %v440_v50, %v433_v14 }
 0x10b   : > { %v442_v55 = vadd.f32 %v440_v50, %v439_v49 }
 0x10c   : > { %v443_v63 = vmul.f32 %v441_v54, %v865_v44 }
 0x10d   : > { %v444_v0 = vmul.f32 %v442_v55, %v867_v45 }
 0x167   : > { %v249_v56 = vpop.xlane.xlu1 %248 }
 0x168   : > { %v251_v59 = vadd.f32 %v250_v51, %v249_v56 }
 0x16a   : > { %v252_v60 = vmul.f32 %v251_v59, %v852_v12 }
 0x16c   : > { %v445_v1 = vmul.f32 %v443_v63, %v252_v60  ;;  %v446_v2 = vmul.f32 %v444_v0, %v252_v60 }
 0x16e   : > { %v447_v5 = vmul.f32 0.5, %v445_v1  ;;  %v448_v6 = vmul.f32 0.5, %v446_v2 }
 0x170   : > { %645 = vtanh.f32 %v447_v5 }
 0x171   : > { %647 = vtanh.f32 %v448_v6 }
 0x17d   : > { %v646_v7 = vpop.eup %645 }
 0x17e   : > { %v648_v8 = vpop.eup %647  ;;  %v451_v9 = vadd.f32 1.0, %v646_v7 }
 0x17f   : > { %v452_v10 = vadd.f32 1.0, %v648_v8 }
 0x180   : > { %v453_v13 = vmul.f32 0.5, %v451_v9 }
 0x181   : > { %v454_v12 = vmul.f32 0.5, %v452_v10 }
 0x182   : > { %v455_v44 = vmul.f32 %v453_v13, %v837_v3 }
 0x183   : > { %v456_v45 = vmul.f32 %v454_v12, %v839_v4 }
 0x184   : > { %457 = vst [vmem:[%s204_s14] sm:$0xff] %v455_v44 }
 0x185   : > { %458 = vst [vmem:[%s204_s14 + $0x8] sm:$0xff] %v456_v45 }
 0x186   : > { %677 = shalt.err (!%p674_p2)
}
 0x187   : > { %s678_s6 = scalar_lea.hbm %s943_s27, 256  ;;  %s682_s9 = scalar_lea.hbm %s982_s4, 512 }
 0x188   : > { %p679_p3 = scmp.ne.s32.totalorder %s943_s27, %s678_s6  ;;  %p683_p8 = scmp.lt.s32.totalorder %s943_s27, %s982_s4 }
 0x189   : > { %p684_p11 = scmp.lt.s32.totalorder %s682_s9, %s678_s6 }
 0x18a   : > { %p680_p4 = pnand %p679_p3, %p798_p5 }
 0x18b   : > { %p685_p9 = por %p684_p11, %p683_p8 }
 0x18c   : > { %p681_p7 = pneg %p680_p4 }
 0x18e   : > { %p686_p10 = pnand %p685_p9, %p681_p7 }
 0x190   : > { %689 = shalt.err (!%p686_p10)
}
 0x191   : > { %569 = dma.vmem_to_hbm [thread:$0]  (%p798_p5), %s475_s20, 256, %s943_s27, %s460_s28  }
 0x192 PF: > { %p581_p12 = scmp.ge.s32.totalorder %s728_s18, 2  ;;  %s486_s12 = sand.u32 1, %s716_s15  }
 0x193   : > { %s487_s13 = scalar_lea.sflag [#allocation3], %s486_s12 }
 0x194   : > { %p576_p13 = pnand %p581_p12, %p802_p6 }
 0x196   : > { %p577_p0 = pneg %p576_p13 }
 0x198   : > { %711 = dma.done.wait (%p577_p0), %s487_s13, 256  }
 0x199   : > { %713 = vsyncadd (%p577_p0), %s487_s13, 4294967040  ;;  %p15_p1 = scmp.ge.s32.totalorder %s785_s21, 4   ;;  %s986_s15 = smov %s720_s16 }
 0x19a   : > { %s987_s16 = smov %s724_s17  ;;  %s988_s17 = smov %s796_s24 }
 0x19b   : > { %s989_s18 = smov %s785_s21  ;;  %17 = sbr.rel (!%p15_p1) target bundleno = 4 (0x4), region = 76 }
 0x1a0   :  { %492 = vsyncpa [#allocation3], 1 }
 0x1a1   :  { %494 = vsyncpa [#allocation3 + $0x1], 1 }
 0x1a2   :  { %495 = vsyncpa [#allocation4], 1 }
 0x1a3   :  { %497 = vsyncpa [#allocation4 + $0x1], 1 }

</bundles_post_ra>
